<compile_context>
chip_gen: v5e
topology: v5e:2x2
jax: 0.10.0
libtpu: 0.0.40
codegen_flags: <defaults>
</compile_context>

<pallas_src>
import functools

import jax
import jax.numpy as jnp
from jax import lax
from jax.experimental import pallas as pl
from jax.experimental.pallas import tpu as pltpu

# Contract the last dim of both operands: a @ b.T without an in-kernel transpose.
_NT_DIMS = (((1,), (1,)), ((), ()))

# MXU operand dtype. bf16 is native on v5e/v6e/v7x (f32 matmul is multi-pass);
# accumulation stays f32 via preferred_element_type.
_MXU_DTYPE = jnp.bfloat16


# ------------------------------- pass 1 ------------------------------------ #

def _row_stats_kernel(a_ref, b_ref, ina_ref, inb_ref, diag_ref, *, eps):
    """Per-row inverse L2 norms of a/b and the diagonal cosine cos(a_i, b_i)."""
    a = a_ref[...]                                           # (bm, D) f32
    b = b_ref[...]                                           # (bm, D) f32
    na = jnp.sqrt(jnp.sum(a * a, axis=-1, keepdims=True))    # (bm, 1)
    nb = jnp.sqrt(jnp.sum(b * b, axis=-1, keepdims=True))    # (bm, 1)
    ab = jnp.sum(a * b, axis=-1, keepdims=True)              # (bm, 1)
    # Per-factor eps clamp so the N^2 kernel is a pure reciprocal-multiply.
    # Differs from max(na*nb, eps) only for near-zero-norm rows.
    sqrt_eps = float(eps) ** 0.5
    ina_ref[...] = 1.0 / jnp.maximum(na, sqrt_eps)
    inb_ref[...] = 1.0 / jnp.maximum(nb, sqrt_eps)
    diag_ref[...] = ab / jnp.maximum(na * nb, eps)            # exact reference formula


# ------------------------------- pass 2 ------------------------------------ #

def _block_scores(a_ref, b_ref, ina_ref, inb_ref):
    # bf16 x bf16 -> f32 on the MXU, then two broadcast VPU multiplies.
    w12 = lax.dot_general(a_ref[...], b_ref[...], _NT_DIMS,
                          preferred_element_type=jnp.float32)   # (bm, bn) f32
    return (w12 * ina_ref[...]) * inb_ref[...]


def _block_mask(i, j, bm, bn, n_valid, has_pad):
    rows = i * bm + lax.broadcasted_iota(jnp.int32, (bm, bn), 0)
    cols = j * bn + lax.broadcasted_iota(jnp.int32, (bm, bn), 1)
    keep = rows != cols
    if has_pad:
        keep = keep & (rows < n_valid) & (cols < n_valid)
    return keep


def _is_special(i, j, has_pad):
    # Diagonal elements only live in i == j blocks (bm == bn); padded rows/cols
    # only live in the last-i / last-j boundary blocks.
    special = i == j
    if has_pad:
        special = special | (i == pl.num_programs(0) - 1) | (j == pl.num_programs(1) - 1)
    return special


def _loss_sum_kernel(a_ref, b_ref, ina_ref, inb_ref, dcol_ref, drow_ref,
                     rsum_ref, *, n_valid, bm, bn, has_pad):
    """sum(cost_s) + sum(cost_im), accumulated per row of the a panel."""
    i = pl.program_id(0)
    j = pl.program_id(1)

    @pl.when(j == 0)
    def _init():
        rsum_ref[...] = jnp.zeros_like(rsum_ref)

    scores = _block_scores(a_ref, b_ref, ina_ref, inb_ref)    # (bm, bn) f32
    dcol = dcol_ref[...]                                      # (bm, 1)  diag_i - margin
    drow = drow_ref[...]                                      # (1, bn)  diag_j - margin

    def accum(keep):
        # scores -> cost_s -> reduce, then reuse for cost_im: at most two live
        # (bm, bn) f32 tiles at any point.
        cost_s = jnp.maximum(scores - dcol, 0.0)
        if keep is not None:
            cost_s = jnp.where(keep, cost_s, 0.0)
        part = jnp.sum(cost_s, axis=1, keepdims=True)
        cost_im = jnp.maximum(scores - drow, 0.0)
        if keep is not None:
            cost_im = jnp.where(keep, cost_im, 0.0)
        rsum_ref[...] += part + jnp.sum(cost_im, axis=1, keepdims=True)

    special = _is_special(i, j, has_pad)

    @pl.when(jnp.logical_not(special))
    def _fast():                       # interior block: no iota / compare / where
        accum(None)

    @pl.when(special)
    def _masked():                     # diagonal and/or padded boundary block
        accum(_block_mask(i, j, bm, bn, n_valid, has_pad))


def _loss_max_kernel(a_ref, b_ref, ina_ref, inb_ref, dcol_ref, drow_ref,
                     rmax_ref, cmax_ref, *, n_valid, bm, bn, has_pad):
    """Running row-max of cost_s and per-(i,j) column-max partials of cost_im."""
    i = pl.program_id(0)
    j = pl.program_id(1)

    # Zero init is valid ONLY because both hinge costs are ReLU'd (>= 0); if the
    # cost ever changes sign, switch to -inf and mask padded rows at the end.
    @pl.when(j == 0)
    def _init():
        rmax_ref[...] = jnp.zeros_like(rmax_ref)

    scores = _block_scores(a_ref, b_ref, ina_ref, inb_ref)
    dcol = dcol_ref[...]
    drow = drow_ref[...]

    def accum(keep):
        cost_s = jnp.maximum(scores - dcol, 0.0)
        if keep is not None:
            cost_s = jnp.where(keep, cost_s, 0.0)
        rmax_ref[...] = jnp.maximum(rmax_ref[...],
                                    jnp.max(cost_s, axis=1, keepdims=True))
        cost_im = jnp.maximum(scores - drow, 0.0)
        if keep is not None:
            cost_im = jnp.where(keep, cost_im, 0.0)
        cmax_ref[0] = jnp.max(cost_im, axis=0, keepdims=True)  # (1, bn) partial

    special = _is_special(i, j, has_pad)

    @pl.when(jnp.logical_not(special))
    def _fast():
        accum(None)

    @pl.when(special)
    def _masked():
        accum(_block_mask(i, j, bm, bn, n_valid, has_pad))


# ------------------------------- wrapper ------------------------------------ #

def _round_up(x, m):
    return ((x + m - 1) // m) * m


def _b_panel_spec(bn, d, n_j):
    """Streaming b row-panel; triple-buffered when D is small (short per-block
    compute could otherwise expose the DMA)."""
    idx = lambda i, j: (j, 0)
    if d <= 128 and n_j > 2 and hasattr(pl, "Buffered"):
        try:
            return pl.BlockSpec((bn, d), idx, pipeline_mode=pl.Buffered(3))
        except TypeError:          # older jax without pipeline_mode kwarg
            pass
    return pl.BlockSpec((bn, d), idx)


def salience_contrastive_loss(im, s, s_l=None, *, cross_attn="i2t", margin=0.0,
                              max_violation=False, eps=1e-8):
    """Forward pass of salience_ContrastiveLoss.

    im: (N, D) image embeddings, s: (N, D) caption embeddings.  s_l (caption
    lengths) is unused by the salience (plain cosine) score and is kept only
    for API parity with the PyTorch module.
    """
    del s_l
    if cross_attn == "t2i":
        a, b = s, im            # scores[i, j] = cos(s_i, im_j)
    elif cross_attn == "i2t":
        a, b = im, s            # scores[i, j] = cos(im_i, s_j)
    else:
        raise ValueError("unknown cross_attn type: %s" % cross_attn)

    n, d = a.shape
    assert b.shape == (n, d)

    # 128-row lane-dense tiles; keep bm = 128 (not n) for 128 < n <= 256 so the
    # leading "parallel" grid axis has >= 2 blocks (both v7x TensorCores busy).
    blk = 128 if n > 128 else _round_up(max(n, 8), 8)
    n_pad = _round_up(n, blk)
    bm = bn = blk                       # bm == bn required by the diag-block logic
    n_i, n_j = n_pad // bm, n_pad // bn
    has_pad = n_pad != n

    a_p = jnp.pad(a.astype(jnp.float32), ((0, n_pad - n), (0, 0)))
    b_p = jnp.pad(b.astype(jnp.float32), ((0, n_pad - n), (0, 0)))

    # ---- pass 1: per-row stats (O(N), hoisted out of the O(N^2) loop) ------ #
    ina, inb, diag = pl.pallas_call(
        functools.partial(_row_stats_kernel, eps=float(eps)),
        out_shape=(jax.ShapeDtypeStruct((n_pad, 1), jnp.float32),
                   jax.ShapeDtypeStruct((n_pad, 1), jnp.float32),
                   jax.ShapeDtypeStruct((n_pad, 1), jnp.float32)),
        grid_spec=pltpu.PrefetchScalarGridSpec(
            num_scalar_prefetch=0,
            grid=(n_i,),
            in_specs=[pl.BlockSpec((bm, d), lambda r: (r, 0)),
                      pl.BlockSpec((bm, d), lambda r: (r, 0))],
            out_specs=[pl.BlockSpec((bm, 1), lambda r: (r, 0)),
                       pl.BlockSpec((bm, 1), lambda r: (r, 0)),
                       pl.BlockSpec((bm, 1), lambda r: (r, 0))]),
        compiler_params=pltpu.CompilerParams(
            dimension_semantics=("parallel",)),
    )(a_p, b_p)

    # O(N) wrapper-side glue: fold the margin into the diagonals; lane-oriented
    # copies for broadcasting along columns (no in-kernel sublane->lane moves).
    dcol = diag - jnp.float32(margin)          # (n_pad, 1)
    drow = dcol.reshape(1, n_pad)              # (1, n_pad)
    inb_row = inb.reshape(1, n_pad)            # (1, n_pad)

    # bf16 MXU operands (f32 accumulation in-kernel); halves HBM reads + VMEM.
    a_mx = a_p.astype(_MXU_DTYPE)
    b_mx = b_p.astype(_MXU_DTYPE)

    in_specs = [
        pl.BlockSpec((bm, d), lambda i, j: (i, 0)),   # a row panel
        _b_panel_spec(bn, d, n_j),                    # b row panel (streamed over j)
        pl.BlockSpec((bm, 1), lambda i, j: (i, 0)),   # 1/||a_i||
        pl.BlockSpec((1, bn), lambda i, j: (0, j)),   # 1/||b_j||        (lane layout)
        pl.BlockSpec((bm, 1), lambda i, j: (i, 0)),   # diag_i - margin
        pl.BlockSpec((1, bn), lambda i, j: (0, j)),   # diag_j - margin  (lane layout)
    ]
    cparams = pltpu.CompilerParams(
        dimension_semantics=("parallel", "arbitrary"))
    args = (a_mx, b_mx, ina, inb_row, dcol, drow)

    # ---- pass 2: fused scores + hinge (+ mask) + block reductions ---------- #
    if max_violation:
        rmax, cmax = pl.pallas_call(
            functools.partial(_loss_max_kernel, n_valid=n, bm=bm, bn=bn,
                              has_pad=has_pad),
            out_shape=(jax.ShapeDtypeStruct((n_pad, 1), jnp.float32),
                       jax.ShapeDtypeStruct((n_i, 1, n_pad), jnp.float32)),
            grid_spec=pltpu.PrefetchScalarGridSpec(
                num_scalar_prefetch=0,
                grid=(n_i, n_j),
                in_specs=in_specs,
                out_specs=[pl.BlockSpec((bm, 1), lambda i, j: (i, 0)),
                           pl.BlockSpec((1, 1, bn), lambda i, j: (i, 0, j))]),
            compiler_params=cparams,
        )(*args)
        # Final O(N)/O(grid)-sized reductions in plain JAX glue.
        return jnp.sum(rmax) + jnp.sum(jnp.max(cmax, axis=0))

    rsum = pl.pallas_call(
        functools.partial(_loss_sum_kernel, n_valid=n, bm=bm, bn=bn,
                          has_pad=has_pad),
        out_shape=jax.ShapeDtypeStruct((n_pad, 1), jnp.float32),
        grid_spec=pltpu.PrefetchScalarGridSpec(
            num_scalar_prefetch=0,
            grid=(n_i, n_j),
            in_specs=in_specs,
            out_specs=pl.BlockSpec((bm, 1), lambda i, j: (i, 0))),
        compiler_params=cparams,
    )(*args)
    return jnp.sum(rsum)


# --------------------------- pure-JAX reference ----------------------------- #

def _loss_ref(im, s, *, cross_attn, margin, max_violation, eps=1e-8):
    a, b = (s, im) if cross_attn == "t2i" else (im, s)
    a = a.astype(jnp.float32)
    b = b.astype(jnp.float32)
    w12 = a @ b.T
    w1 = jnp.sqrt(jnp.sum(a * a, axis=-1, keepdims=True))       # (N, 1)
    w2 = jnp.sqrt(jnp.sum(b * b, axis=-1, keepdims=True)).T     # (1, N)
    scores = w12 / jnp.maximum(w1 * w2, eps)
    diag = jnp.diagonal(scores).reshape(-1, 1)
    cost_s = jnp.maximum(margin + scores - diag, 0.0)
    cost_im = jnp.maximum(margin + scores - diag.T, 0.0)
    eye = jnp.eye(scores.shape[0], dtype=bool)
    cost_s = jnp.where(eye, 0.0, cost_s)
    cost_im = jnp.where(eye, 0.0, cost_im)
    if max_violation:
        return jnp.sum(jnp.max(cost_s, axis=1)) + jnp.sum(jnp.max(cost_im, axis=0))
    return jnp.sum(cost_s) + jnp.sum(cost_im)


# ------------------------------------ main ----------------------------------- #

if __name__ == "__main__":
    key = jax.random.PRNGKey(0)
    margin = 0.2

    loss_fn = jax.jit(
        salience_contrastive_loss,
        static_argnames=("cross_attn", "margin", "max_violation", "eps"))

    # (N, D, cross_attn, max_violation) — covers the diag-masked single block,
    # padded boundary blocks, multi-block padded grids, and (N=384) grids with
    # unmasked interior fast-path blocks + the Buffered(3) streaming b panel.
    tests = [
        (8, 128, "i2t", False),
        (8, 128, "t2i", True),
        (6, 96, "i2t", False),
        (200, 64, "i2t", True),
        (200, 64, "t2i", False),
        (384, 64, "i2t", False),
        (384, 64, "t2i", True),
    ]

    for n, d, cross_attn, max_violation in tests:
        k_im, k_s = jax.random.split(jax.random.fold_in(key, n * 1000 + d), 2)
        im = jax.random.normal(k_im, (n, d), jnp.float32)
        s = jax.random.normal(k_s, (n, d), jnp.float32)
        s_l = jnp.full((n,), 10, jnp.int32)   # unused by the salience score

        out = loss_fn(im, s, s_l, cross_attn=cross_attn, margin=margin,
                      max_violation=max_violation)
        out = jax.block_until_ready(out)

        ref = _loss_ref(im, s, cross_attn=cross_attn, margin=margin,
                        max_violation=max_violation)
        err = abs(float(out) - float(ref))
        # bf16 MXU operands vs. the f32 reference: allow ~2e-3 relative.
        tol = 2e-3 * (1.0 + abs(float(ref)))
        assert err < tol, (n, d, cross_attn, max_violation, float(out), float(ref), err)

    print("KERNEL_OK")
</pallas_src>

<mosaic_0001>
module attributes {stable_mosaic.version = 11 : i64} {
  func.func @_row_stats_kernel(%arg0: i32, %arg1: memref<8x128xf32, #tpu.memory_space<vmem>>, %arg2: memref<8x128xf32, #tpu.memory_space<vmem>>, %arg3: memref<8x1xf32, #tpu.memory_space<vmem>>, %arg4: memref<8x1xf32, #tpu.memory_space<vmem>>, %arg5: memref<8x1xf32, #tpu.memory_space<vmem>>) attributes {dimension_semantics = [#tpu.dimension_semantics<parallel>], iteration_bounds = array<i64: 1>, scalar_prefetch = 0 : i64, scratch_operands = 0 : i64, tpu.core_type = #tpu.core_type<tc>, window_params = [{transform_indices = @transform_0, window_bounds = array<i64: 8, 128>}, {transform_indices = @transform_1, window_bounds = array<i64: 8, 128>}, {transform_indices = @transform_2, window_bounds = array<i64: 8, 1>}, {transform_indices = @transform_3, window_bounds = array<i64: 8, 1>}, {transform_indices = @transform_4, window_bounds = array<i64: 8, 1>}]} {
    %c0 = arith.constant 0 : index
    %c0_0 = arith.constant 0 : index
    %0 = vector.load %arg1[%c0, %c0_0] : memref<8x128xf32, #tpu.memory_space<vmem>>, vector<8x128xf32>
    %c0_1 = arith.constant 0 : index
    %c0_2 = arith.constant 0 : index
    %1 = vector.load %arg2[%c0_1, %c0_2] : memref<8x128xf32, #tpu.memory_space<vmem>>, vector<8x128xf32>
    %2 = arith.mulf %0, %0 : vector<8x128xf32>
    %cst = arith.constant dense<0.000000e+00> : vector<8xf32>
    %3 = vector.multi_reduction <add>, %2, %cst [1] : vector<8x128xf32> to vector<8xf32>
    %4 = vector.shape_cast %3 : vector<8xf32> to vector<8x1xf32>
    %5 = math.sqrt %4 : vector<8x1xf32>
    %6 = arith.mulf %1, %1 : vector<8x128xf32>
    %cst_3 = arith.constant dense<0.000000e+00> : vector<8xf32>
    %7 = vector.multi_reduction <add>, %6, %cst_3 [1] : vector<8x128xf32> to vector<8xf32>
    %8 = vector.shape_cast %7 : vector<8xf32> to vector<8x1xf32>
    %9 = math.sqrt %8 : vector<8x1xf32>
    %10 = arith.mulf %0, %1 : vector<8x128xf32>
    %cst_4 = arith.constant dense<0.000000e+00> : vector<8xf32>
    %11 = vector.multi_reduction <add>, %10, %cst_4 [1] : vector<8x128xf32> to vector<8xf32>
    %12 = vector.shape_cast %11 : vector<8xf32> to vector<8x1xf32>
    %cst_5 = arith.constant 9.99999974E-5 : f32
    %13 = vector.broadcast %cst_5 : f32 to vector<8x1xf32>
    %14 = arith.maximumf %5, %13 : vector<8x1xf32>
    %cst_6 = arith.constant 1.000000e+00 : f32
    %15 = vector.broadcast %cst_6 : f32 to vector<8x1xf32>
    %16 = arith.divf %15, %14 : vector<8x1xf32>
    %c0_7 = arith.constant 0 : index
    %c0_8 = arith.constant 0 : index
    %17 = vector.load %arg3[%c0_7, %c0_8] : memref<8x1xf32, #tpu.memory_space<vmem>>, vector<8x1xf32>
    tpu.vector_store %arg3[%c0_7, %c0_8], %16 {strides = array<i32>} : memref<8x1xf32, #tpu.memory_space<vmem>>, vector<8x1xf32>,
    %cst_9 = arith.constant 9.99999974E-5 : f32
    %18 = vector.broadcast %cst_9 : f32 to vector<8x1xf32>
    %19 = arith.maximumf %9, %18 : vector<8x1xf32>
    %cst_10 = arith.constant 1.000000e+00 : f32
    %20 = vector.broadcast %cst_10 : f32 to vector<8x1xf32>
    %21 = arith.divf %20, %19 : vector<8x1xf32>
    %c0_11 = arith.constant 0 : index
    %c0_12 = arith.constant 0 : index
    %22 = vector.load %arg4[%c0_11, %c0_12] : memref<8x1xf32, #tpu.memory_space<vmem>>, vector<8x1xf32>
    tpu.vector_store %arg4[%c0_11, %c0_12], %21 {strides = array<i32>} : memref<8x1xf32, #tpu.memory_space<vmem>>, vector<8x1xf32>,
    %23 = arith.mulf %5, %9 : vector<8x1xf32>
    %cst_13 = arith.constant 9.99999993E-9 : f32
    %24 = vector.broadcast %cst_13 : f32 to vector<8x1xf32>
    %25 = arith.maximumf %23, %24 : vector<8x1xf32>
    %26 = arith.divf %12, %25 : vector<8x1xf32>
    %c0_14 = arith.constant 0 : index
    %c0_15 = arith.constant 0 : index
    %27 = vector.load %arg5[%c0_14, %c0_15] : memref<8x1xf32, #tpu.memory_space<vmem>>, vector<8x1xf32>
    tpu.vector_store %arg5[%c0_14, %c0_15], %26 {strides = array<i32>} : memref<8x1xf32, #tpu.memory_space<vmem>>, vector<8x1xf32>,
    return
  }
  func.func @transform_0(%arg0: i32) -> (i32, i32) {
    %c0_i32 = arith.constant 0 : i32
    %c0_i32_0 = arith.constant 0 : i32
    return %arg0, %c0_i32 : i32, i32
  }
  func.func @transform_1(%arg0: i32) -> (i32, i32) {
    %c0_i32 = arith.constant 0 : i32
    %c0_i32_0 = arith.constant 0 : i32
    return %arg0, %c0_i32 : i32, i32
  }
  func.func @transform_2(%arg0: i32) -> (i32, i32) {
    %c0_i32 = arith.constant 0 : i32
    %c0_i32_0 = arith.constant 0 : i32
    return %arg0, %c0_i32 : i32, i32
  }
  func.func @transform_3(%arg0: i32) -> (i32, i32) {
    %c0_i32 = arith.constant 0 : i32
    %c0_i32_0 = arith.constant 0 : i32
    return %arg0, %c0_i32 : i32, i32
  }
  func.func @transform_4(%arg0: i32) -> (i32, i32) {
    %c0_i32 = arith.constant 0 : i32
    %c0_i32_0 = arith.constant 0 : i32
    return %arg0, %c0_i32 : i32, i32
  }
}

module attributes {stable_mosaic.version = 11 : i64} {
  func.func @_loss_sum_kernel(%arg0: i32, %arg1: i32, %arg2: memref<8x128xbf16, #tpu.memory_space<vmem>>, %arg3: memref<8x128xbf16, #tpu.memory_space<vmem>>, %arg4: memref<8x1xf32, #tpu.memory_space<vmem>>, %arg5: memref<1x8xf32, #tpu.memory_space<vmem>>, %arg6: memref<8x1xf32, #tpu.memory_space<vmem>>, %arg7: memref<1x8xf32, #tpu.memory_space<vmem>>, %arg8: memref<8x1xf32, #tpu.memory_space<vmem>>) attributes {dimension_semantics = [#tpu.dimension_semantics<parallel>, #tpu.dimension_semantics<arbitrary>], iteration_bounds = array<i64: 1, 1>, scalar_prefetch = 0 : i64, scratch_operands = 0 : i64, tpu.core_type = #tpu.core_type<tc>, window_params = [{transform_indices = @transform_0, window_bounds = array<i64: 8, 128>}, {transform_indices = @transform_1, window_bounds = array<i64: 8, 128>}, {transform_indices = @transform_2, window_bounds = array<i64: 8, 1>}, {transform_indices = @transform_3, window_bounds = array<i64: 1, 8>}, {transform_indices = @transform_4, window_bounds = array<i64: 8, 1>}, {transform_indices = @transform_5, window_bounds = array<i64: 1, 8>}, {transform_indices = @transform_6, window_bounds = array<i64: 8, 1>}]} {
    %c0_i32 = arith.constant 0 : i32
    %0 = arith.cmpi eq, %arg1, %c0_i32 : i32
    %1 = arith.extui %0 : i1 to i32
    %c0_i32_0 = arith.constant 0 : i32
    %2 = arith.cmpi ne, %1, %c0_i32_0 : i32
    scf.if %2 {
      %cst_14 = arith.constant 0.000000e+00 : f32
      %20 = vector.broadcast %cst_14 : f32 to vector<8x1xf32>
      %c0_15 = arith.constant 0 : index
      %c0_16 = arith.constant 0 : index
      %21 = vector.load %arg8[%c0_15, %c0_16] : memref<8x1xf32, #tpu.memory_space<vmem>>, vector<8x1xf32>
      tpu.vector_store %arg8[%c0_15, %c0_16], %20 {strides = array<i32>} : memref<8x1xf32, #tpu.memory_space<vmem>>, vector<8x1xf32>,
    } else {
    }
    %c0 = arith.constant 0 : index
    %c0_1 = arith.constant 0 : index
    %3 = vector.load %arg2[%c0, %c0_1] : memref<8x128xbf16, #tpu.memory_space<vmem>>, vector<8x128xbf16>
    %c0_2 = arith.constant 0 : index
    %c0_3 = arith.constant 0 : index
    %4 = vector.load %arg3[%c0_2, %c0_3] : memref<8x128xbf16, #tpu.memory_space<vmem>>, vector<8x128xbf16>
    %cst = arith.constant dense<0.000000e+00> : vector<8x8xf32>
    %5 = tpu.matmul %3, %4, %cst {dimension_numbers = #tpu.dot_dimension_numbers<[1], [1], [0], [0], [0, 0, 1, 0], [], []>} : vector<8x128xbf16>, vector<8x128xbf16>, vector<8x8xf32> -> vector<8x8xf32>
    %c0_4 = arith.constant 0 : index
    %c0_5 = arith.constant 0 : index
    %6 = vector.load %arg4[%c0_4, %c0_5] : memref<8x1xf32, #tpu.memory_space<vmem>>, vector<8x1xf32>
    %7 = vector.broadcast %6 : vector<8x1xf32> to vector<8x8xf32>
    %8 = arith.mulf %5, %7 : vector<8x8xf32>
    %c0_6 = arith.constant 0 : index
    %c0_7 = arith.constant 0 : index
    %9 = vector.load %arg5[%c0_6, %c0_7] : memref<1x8xf32, #tpu.memory_space<vmem>>, vector<1x8xf32>
    %10 = vector.broadcast %9 : vector<1x8xf32> to vector<8x8xf32>
    %11 = arith.mulf %8, %10 : vector<8x8xf32>
    %c0_8 = arith.constant 0 : index
    %c0_9 = arith.constant 0 : index
    %12 = vector.load %arg6[%c0_8, %c0_9] : memref<8x1xf32, #tpu.memory_space<vmem>>, vector<8x1xf32>
    %c0_10 = arith.constant 0 : index
    %c0_11 = arith.constant 0 : index
    %13 = vector.load %arg7[%c0_10, %c0_11] : memref<1x8xf32, #tpu.memory_space<vmem>>, vector<1x8xf32>
    %14 = arith.cmpi eq, %arg0, %arg1 : i32
    %true = arith.constant true
    %15 = arith.xori %14, %true : i1
    %16 = arith.extui %15 : i1 to i32
    %c0_i32_12 = arith.constant 0 : i32
    %17 = arith.cmpi ne, %16, %c0_i32_12 : i32
    scf.if %17 {
      %20 = vector.broadcast %12 : vector<8x1xf32> to vector<8x8xf32>
      %21 = arith.subf %11, %20 : vector<8x8xf32>
      %cst_14 = arith.constant 0.000000e+00 : f32
      %22 = vector.broadcast %cst_14 : f32 to vector<8x8xf32>
      %23 = arith.maximumf %21, %22 : vector<8x8xf32>
      %cst_15 = arith.constant dense<0.000000e+00> : vector<8xf32>
      %24 = vector.multi_reduction <add>, %23, %cst_15 [1] : vector<8x8xf32> to vector<8xf32>
      %25 = vector.shape_cast %24 : vector<8xf32> to vector<8x1xf32>
      %26 = vector.broadcast %13 : vector<1x8xf32> to vector<8x8xf32>
      %27 = arith.subf %11, %26 : vector<8x8xf32>
      %cst_16 = arith.constant 0.000000e+00 : f32
      %28 = vector.broadcast %cst_16 : f32 to vector<8x8xf32>
      %29 = arith.maximumf %27, %28 : vector<8x8xf32>
      %c0_17 = arith.constant 0 : index
      %c0_18 = arith.constant 0 : index
      %30 = vector.load %arg8[%c0_17, %c0_18] : memref<8x1xf32, #tpu.memory_space<vmem>>, vector<8x1xf32>
      %cst_19 = arith.constant dense<0.000000e+00> : vector<8xf32>
      %31 = vector.multi_reduction <add>, %29, %cst_19 [1] : vector<8x8xf32> to vector<8xf32>
      %32 = vector.shape_cast %31 : vector<8xf32> to vector<8x1xf32>
      %33 = arith.addf %25, %32 : vector<8x1xf32>
      %34 = arith.addf %30, %33 : vector<8x1xf32>
      %c0_20 = arith.constant 0 : index
      %c0_21 = arith.constant 0 : index
      %35 = vector.load %arg8[%c0_20, %c0_21] : memref<8x1xf32, #tpu.memory_space<vmem>>, vector<8x1xf32>
      tpu.vector_store %arg8[%c0_20, %c0_21], %34 {strides = array<i32>} : memref<8x1xf32, #tpu.memory_space<vmem>>, vector<8x1xf32>,
    } else {
    }
    %18 = arith.extui %14 : i1 to i32
    %c0_i32_13 = arith.constant 0 : i32
    %19 = arith.cmpi ne, %18, %c0_i32_13 : i32
    scf.if %19 {
      %c8_i32 = arith.constant 8 : i32
      %20 = arith.muli %arg0, %c8_i32 : i32
      %21 = tpu.iota {dimensions = array<i32: 0>} : vector<8x8xi32>
      %22 = vector.broadcast %20 : i32 to vector<8x8xi32>
      %23 = arith.addi %22, %21 : vector<8x8xi32>
      %c8_i32_14 = arith.constant 8 : i32
      %24 = arith.muli %arg1, %c8_i32_14 : i32
      %25 = tpu.iota {dimensions = array<i32: 1>} : vector<8x8xi32>
      %26 = vector.broadcast %24 : i32 to vector<8x8xi32>
      %27 = arith.addi %26, %25 : vector<8x8xi32>
      %28 = arith.cmpi ne, %23, %27 : vector<8x8xi32>
      %29 = vector.broadcast %12 : vector<8x1xf32> to vector<8x8xf32>
      %30 = arith.subf %11, %29 : vector<8x8xf32>
      %cst_15 = arith.constant 0.000000e+00 : f32
      %31 = vector.broadcast %cst_15 : f32 to vector<8x8xf32>
      %32 = arith.maximumf %30, %31 : vector<8x8xf32>
      %cst_16 = arith.constant 0.000000e+00 : f32
      %33 = vector.broadcast %cst_16 : f32 to vector<8x8xf32>
      %34 = arith.select %28, %32, %33 : vector<8x8xi1>, vector<8x8xf32>
      %cst_17 = arith.constant dense<0.000000e+00> : vector<8xf32>
      %35 = vector.multi_reduction <add>, %34, %cst_17 [1] : vector<8x8xf32> to vector<8xf32>
      %36 = vector.shape_cast %35 : vector<8xf32> to vector<8x1xf32>
      %37 = vector.broadcast %13 : vector<1x8xf32> to vector<8x8xf32>
      %38 = arith.subf %11, %37 : vector<8x8xf32>
      %cst_18 = arith.constant 0.000000e+00 : f32
      %39 = vector.broadcast %cst_18 : f32 to vector<8x8xf32>
      %40 = arith.maximumf %38, %39 : vector<8x8xf32>
      %cst_19 = arith.constant 0.000000e+00 : f32
      %41 = vector.broadcast %cst_19 : f32 to vector<8x8xf32>
      %42 = arith.select %28, %40, %41 : vector<8x8xi1>, vector<8x8xf32>
      %c0_20 = arith.constant 0 : index
      %c0_21 = arith.constant 0 : index
      %43 = vector.load %arg8[%c0_20, %c0_21] : memref<8x1xf32, #tpu.memory_space<vmem>>, vector<8x1xf32>
      %cst_22 = arith.constant dense<0.000000e+00> : vector<8xf32>
      %44 = vector.multi_reduction <add>, %42, %cst_22 [1] : vector<8x8xf32> to vector<8xf32>
      %45 = vector.shape_cast %44 : vector<8xf32> to vector<8x1xf32>
      %46 = arith.addf %36, %45 : vector<8x1xf32>
      %47 = arith.addf %43, %46 : vector<8x1xf32>
      %c0_23 = arith.constant 0 : index
      %c0_24 = arith.constant 0 : index
      %48 = vector.load %arg8[%c0_23, %c0_24] : memref<8x1xf32, #tpu.memory_space<vmem>>, vector<8x1xf32>
      tpu.vector_store %arg8[%c0_23, %c0_24], %47 {strides = array<i32>} : memref<8x1xf32, #tpu.memory_space<vmem>>, vector<8x1xf32>,
    } else {
    }
    return
  }
  func.func @transform_0(%arg0: i32, %arg1: i32) -> (i32, i32) {
    %c0_i32 = arith.constant 0 : i32
    %c0_i32_0 = arith.constant 0 : i32
    return %arg0, %c0_i32 : i32, i32
  }
  func.func @transform_1(%arg0: i32, %arg1: i32) -> (i32, i32) {
    %c0_i32 = arith.constant 0 : i32
    %c0_i32_0 = arith.constant 0 : i32
    return %arg1, %c0_i32 : i32, i32
  }
  func.func @transform_2(%arg0: i32, %arg1: i32) -> (i32, i32) {
    %c0_i32 = arith.constant 0 : i32
    %c0_i32_0 = arith.constant 0 : i32
    return %arg0, %c0_i32 : i32, i32
  }
  func.func @transform_3(%arg0: i32, %arg1: i32) -> (i32, i32) {
    %c0_i32 = arith.constant 0 : i32
    %c0_i32_0 = arith.constant 0 : i32
    return %c0_i32, %arg1 : i32, i32
  }
  func.func @transform_4(%arg0: i32, %arg1: i32) -> (i32, i32) {
    %c0_i32 = arith.constant 0 : i32
    %c0_i32_0 = arith.constant 0 : i32
    return %arg0, %c0_i32 : i32, i32
  }
  func.func @transform_5(%arg0: i32, %arg1: i32) -> (i32, i32) {
    %c0_i32 = arith.constant 0 : i32
    %c0_i32_0 = arith.constant 0 : i32
    return %c0_i32, %arg1 : i32, i32
  }
  func.func @transform_6(%arg0: i32, %arg1: i32) -> (i32, i32) {
    %c0_i32 = arith.constant 0 : i32
    %c0_i32_0 = arith.constant 0 : i32
    return %arg0, %c0_i32 : i32, i32
  }
}

</mosaic_0001>

<bundles_post_ra>
// kernel: salience_contrastive_loss.2
= control target key start
LH: loop header
LB: loop body
LE: loop exit
PB: predicated region body
PF: predicated region fallthrough
CT: control target
= control target key end

     0   :  { %vm65_vm6 = vcmask 7168   ;;  %s167_s0 = inlined_call_operand.vmem [shape: f32[8,128], index: 0, kind: input, shape index: {}]   ;;  %s168_s1 = inlined_call_operand.vmem [shape: f32[8,128], index: 1, kind: input, shape index: {}]   ;;  %s169_s2 = inlined_call_operand.vmem [shape: f32[8,1], index: 2, kind: output, shape index: {0}]   ;;  %s170_s3 = inlined_call_operand.vmem [shape: f32[8,1], index: 3, kind: output, shape index: {1}]   ;;  %s171_s4 = inlined_call_operand.vmem [shape: f32[8,1], index: 4, kind: output, shape index: {2}]  }
   0x1   :  { %v14_v0 = vld [vmem:[%s167_s0] sm:$0xff] }
   0x2   :  { %v15_v1 = vld [vmem:[%s168_s1] sm:$0xff]  ;;  %v16_v2 = vmul.f32 %v14_v0, %v14_v0 }
   0x3   :  { %v46_v3 = vmul.f32 %v15_v1, %v14_v0  ;;  %v31_v4 = vmul.f32 %v15_v1, %v15_v1 }
   0x4   :  { %17 = vadd.xlane.f32.xlu0 %v16_v2 }
   0x5   :  { %47 = vadd.xlane.f32.xlu1 %v46_v3 }
   0xc   :  { %32 = vadd.xlane.f32.xlu0 %v31_v4 }
  0x77   :  { %v18_v5 = vpop.xlane.xlu0 %17 }
  0x78   :  { %114 = vrsqrt.f32 %v18_v5  ;;  %vm26_vm0 = vcmp.eq.f32.partialorder %v18_v5, inf  ;;  %v29_v17 = vand.u32 2147483648, %v18_v5  ;;  %vm28_vm1 = vcmp.eq.f32.partialorder %v18_v5, 0.0  ;;  %v48_v57 = vpop.xlane.xlu1 %47 }
  0x7e   :  { %v115_v6 = vpop.eup %114 }
  0x7f   :  { %v20_v7 = vmul.f32 %v115_v6, %v18_v5  ;;  %v33_v8 = vpop.xlane.xlu0 %32 }
  0x80   :  { %116 = vrsqrt.f32 %v33_v8  ;;  %vm41_vm2 = vcmp.eq.f32.partialorder %v33_v8, inf  ;;  %v44_v25 = vand.u32 2147483648, %v33_v8  ;;  %vm43_vm3 = vcmp.eq.f32.partialorder %v33_v8, 0.0 }
  0x81   :  { %v21_v9 = vmul.f32 %v115_v6, %v20_v7 }
  0x83   :  { %v22_v10 = vmul.f32 0.5, %v21_v9 }
  0x85   :  { %v23_v11 = vsub.f32 1.5, %v22_v10 }
  0x86   :  { %v117_v12 = vpop.eup %116 }
  0x87   :  { %v24_v13 = vmul.f32 %v115_v6, %v23_v11  ;;  %v35_v14 = vmul.f32 %v117_v12, %v33_v8 }
  0x89   :  { %v25_v15 = vmul.f32 %v24_v13, %v18_v5  ;;  %v36_v16 = vmul.f32 %v117_v12, %v35_v14 }
  0x8b   :  { %v27_v18 = vsel %vm26_vm0, %v18_v5, %v25_v15  ;;  %v37_v19 = vmul.f32 0.5, %v36_v16 }
  0x8c   :  { %v30_v20 = vsel %vm28_vm1, %v29_v17, %v27_v18 }
  0x8d   :  { %v49_v21 = vmax.f32 %v30_v20, 0.0001  ;;  %v38_v22 = vsub.f32 1.5, %v37_v19 }
  0x8f   :  { %118 = vrcp.f32 %v49_v21  ;;  %v39_v23 = vmul.f32 %v117_v12, %v38_v22  ;;  %v61_v34 = vand.u32 2147483648, %v49_v21  ;;  %v59_v36 = vand.u32 2147483647, %v49_v21 }
  0x90   :  { %vm55_vm5 = vweird.f32 %v49_v21 }
  0x91   :  { %v40_v24 = vmul.f32 %v39_v23, %v33_v8  ;;  %v62_v39 = vor.u32 1.1754944e-38, %v61_v34  ;;  %vm60_vm8 = vcmp.eq.f32.partialorder %v59_v36, 8.507059e+37 }
  0x93   :  { %v42_v26 = vsel %vm41_vm2, %v33_v8, %v40_v24 }
  0x94   :  { %v45_v27 = vsel %vm43_vm3, %v44_v25, %v42_v26 }
  0x95   :  { %v119_v28 = vpop.eup %118  ;;  %v67_v29 = vmax.f32 %v45_v27, 0.0001  ;;  %v84_v30 = vmul.f32 %v45_v27, %v30_v20 }
  0x96   :  { %v51_v31 = vmul.f32 %v119_v28, %v49_v21  ;;  %vm56_vm4 = vweird.f32 %v119_v28 }
  0x97   :  { %120 = vrcp.f32 %v67_v29  ;;  %v85_v32 = vmax.f32 %v84_v30, 1e-08  ;;  %vm57_vm7 = vmor %vm55_vm5, %vm56_vm4  ;;  %v79_v46 = vand.u32 2147483648, %v67_v29  ;;  %v77_v48 = vand.u32 2147483647, %v67_v29 }
  0x98   :  { %v52_v33 = vsub.f32 1.0, %v51_v31  ;;  %vm73_vm10 = vweird.f32 %v67_v29 }
  0x99   :  { %122 = vrcp.f32 %v85_v32  ;;  %v97_v50 = vand.u32 2147483648, %v85_v32  ;;  %v95_v53 = vand.u32 2147483647, %v85_v32  ;;  %v80_v54 = vor.u32 1.1754944e-38, %v79_v46 }
  0x9a   :  { %v53_v35 = vmul.f32 %v119_v28, %v52_v33  ;;  %vm78_vm13 = vcmp.eq.f32.partialorder %v77_v48, 8.507059e+37  ;;  %vm91_vm14 = vweird.f32 %v85_v32 }
  0x9b   :  { %v98_v59 = vor.u32 1.1754944e-38, %v97_v50  ;;  %vm96_vm0 = vcmp.eq.f32.partialorder %v95_v53, 8.507059e+37 }
  0x9c   :  { %v54_v37 = vadd.f32 %v119_v28, %v53_v35 }
  0x9d   :  { %v121_v38 = vpop.eup %120 }
  0x9e   :  { %v58_v40 = vsel %vm57_vm7, %v119_v28, %v54_v37  ;;  %v69_v41 = vmul.f32 %v121_v38, %v67_v29  ;;  %vm74_vm9 = vweird.f32 %v121_v38 }
  0x9f   :  { %v123_v42 = vpop.eup %122  ;;  %v63_v43 = vsel %vm60_vm8, %v62_v39, %v58_v40  ;;  %vm75_vm12 = vmor %vm73_vm10, %vm74_vm9 }
  0xa0   :  { %66 = vst.msk [vmem:[%s169_s2] sm:$0xff] %vm65_vm6, %v63_v43  ;;  %v70_v44 = vsub.f32 1.0, %v69_v41  ;;  %v87_v45 = vmul.f32 %v123_v42, %v85_v32  ;;  %vm92_vm11 = vweird.f32 %v123_v42 }
  0xa1   :  { %vm93_vm15 = vmor %vm91_vm14, %vm92_vm11 }
  0xa2   :  { %v71_v47 = vmul.f32 %v121_v38, %v70_v44  ;;  %v88_v49 = vsub.f32 1.0, %v87_v45 }
  0xa4   :  { %v72_v51 = vadd.f32 %v121_v38, %v71_v47  ;;  %v89_v52 = vmul.f32 %v123_v42, %v88_v49 }
  0xa6   :  { %v76_v55 = vsel %vm75_vm12, %v121_v38, %v72_v51  ;;  %v90_v56 = vadd.f32 %v123_v42, %v89_v52 }
  0xa7   :  { %v81_v58 = vsel %vm78_vm13, %v80_v54, %v76_v55 }
  0xa8   :  { %83 = vst.msk [vmem:[%s170_s3] sm:$0xff] %vm65_vm6, %v81_v58  ;;  %v94_v60 = vsel %vm93_vm15, %v123_v42, %v90_v56 }
  0xa9   :  { %v99_v61 = vsel %vm96_vm0, %v98_v59, %v94_v60 }
  0xaa   :  { %v100_v62 = vmul.f32 %v99_v61, %v48_v57 }
  0xac   :  { %101 = vst.msk [vmem:[%s171_s4] sm:$0xff] %vm65_vm6, %v100_v62 }

// kernel: salience_contrastive_loss.3
= control target key start
LH: loop header
LB: loop body
LE: loop exit
PB: predicated region body
PF: predicated region fallthrough
CT: control target
= control target key end

     0   :  { %v137_v1 = vmov 0   ;;  %v92_v6 = vlaneseq  ;;  %vm110_vm1 = vcmask 64512   ;;  %vm28_vm2 = vcmask 7168   ;;  %s201_s1 = inlined_call_operand.vmem [shape: bf16[8,128], index: 1, kind: input, shape index: {}]   ;;  %s202_s2 = inlined_call_operand.vmem [shape: f32[8,1], index: 2, kind: input, shape index: {}]   ;;  %s203_s3 = inlined_call_operand.vmem [shape: f32[1,8], index: 3, kind: input, shape index: {}]   ;;  %s204_s0 = inlined_call_operand.vmem [shape: bf16[8,128], index: 0, kind: input, shape index: {}]   ;;  %s205_s4 = inlined_call_operand.vmem [shape: f32[8,1], index: 4, kind: input, shape index: {}]   ;;  %s206_s5 = inlined_call_operand.vmem [shape: f32[1,8], index: 5, kind: input, shape index: {}]   ;;  %s207_s6 = inlined_call_operand.vmem [shape: f32[8,1], index: 6, kind: output, shape index: {}]  }
   0x1   :  { %v31_v0 = vld [vmem:[%s201_s1] sm:$0xf]  ;;  %134 = vset.pattern.permute.xlu0 %v137_v1  ;;  %v138_v24 = vmov 0.0  }
   0x2   :  { %v45_v2 = vld [vmem:[%s202_s2] sm:$0xff]  ;;  %39 = vmatpush.bf16.xpose.msra.mxu0 %v31_v0  ;;  %v93_v10 = vshrl.u32 %v92_v6, 7  ;;  %v98_v11 = vand.u32 127, %v92_v6  ;;  %29 = vst.msk [vmem:[%s207_s6] sm:$0xff] %vm28_vm2, %v138_v24 }
   0x3   :  { %48 = vperm.xlu0 %134, %v45_v2   ;;  %v30_v3 = vld [vmem:[%s204_s0] sm:$0xf] }
   0x4   :  { %v57_v4 = vld [vmem:[%s205_s4] sm:$0xff]  ;;  %vm101_vm0 = vcmp.ne.s32.totalorder %v93_v10, %v98_v11 }
   0x5   :  { %v135_v7 = vld [vmem:[%s203_s3] ss:$0 sm:$0xff] }
   0x6   :  { %v136_v13 = vld [vmem:[%s206_s5] ss:$0 sm:$0xff] }
   0x9   :  { %40 = vmatmul.bf16.vlgmr.msra.gmra.mxu0 %v30_v3  ;;  %v120_v26 = vld [vmem:[%s207_s6] sm:$0xff] }
   0xb   :  { %104 = vperm.xlu0 %134, %v57_v4  }
  0x75   :  { %v49_v5 = vpop.permute.xlu0 %48 }
  0x7d   :  { %v105_v14 = vpop.permute.xlu0 %104 }
  0x86   :  { %v41_v8 = vpop.f32.mrf.mxu0 }
  0x87   :  { %v51_v9 = vmul.f32 %v49_v5, %v41_v8 }
  0x89   :  { %v56_v12 = vmul.f32 %v135_v7, %v51_v9 }
  0x8b   :  { %v107_v15 = vsub.f32 %v56_v12, %v105_v14  ;;  %v117_v17 = vsub.f32 %v56_v12, %v136_v13 }
  0x8d   :  { %v108_v16 = vmax.f32 %v107_v15, 0.0  ;;  %v118_v21 = vmax.f32 %v117_v17, 0.0 }
  0x8e   :  { %v43_v18 = vpop.f32.mrf.mxu0 }
  0x8f   :  { %v109_v19 = vsel %vm101_vm0, %v108_v16, 0.0  ;;  %v119_v22 = vsel %vm101_vm0, %v118_v21, 0.0 }
  0x90   :  { %v111_v20 = vsel %vm110_vm1, %v109_v19, 0.0  ;;  %v121_v23 = vsel %vm110_vm1, %v119_v22, 0.0 }
  0x91   :  { %112 = vadd.xlane.f32.xlu1 %v111_v20 }
  0x99   :  { %122 = vadd.xlane.f32.xlu1 %v121_v23 }
 0x104   :  { %v113_v25 = vpop.xlane.xlu1 %112 }
 0x10c   :  { %v123_v27 = vpop.xlane.xlu1 %122 }
 0x10d   :  { %v124_v28 = vadd.f32 %v123_v27, %v113_v25 }
 0x10f   :  { %v125_v29 = vadd.f32 %v124_v28, %v120_v26 }
 0x111   :  { %127 = vst.msk [vmem:[%s207_s6] sm:$0xff] %vm28_vm2, %v125_v29 }

</bundles_post_ra>
